<compile_context>
chip_gen: v7x
topology: tpu7x:2x2x1
jax: 0.10.0
libtpu: 0.0.40
codegen_flags: <defaults>
</compile_context>

<pallas_src>
import jax
import jax.numpy as jnp
from jax.experimental import pallas as pl
from jax.experimental.pallas import tpu as pltpu

_LANE = 128
_BN_FEATURES = 300
_PACK_STRIDE = 32            # lane offsets 0 / 32 / 64 for mu / logvar / z


def _round_up(n, m):
    return ((n + m - 1) // m) * m


def _vmem_capacity_bytes():
    try:
        return int(pltpu.get_tpu_info().vmem_capacity_bytes)
    except Exception:
        return 64 * 1024 * 1024          # conservative: v7x per-TC VMEM


# ----------------------------------------------------------------------------
# Kernel
# ----------------------------------------------------------------------------
def _make_kernel(pack_output):
    def kernel(x_ref, w1_ref, b1_ref, w2_ref, b2_ref,
               gamma_ref, beta_ref, w3_ref, b3_ref, eps_ref, out_ref):
        f32 = jnp.float32
        lat_p = eps_ref.shape[-1]          # padded latent block width (128-mult)

        # Linear(image_size -> hidden) + LeakyReLU(0.2).
        # x already arrives in the weight dtype (wrapper cast) -> native MXU
        # rate with bf16 weights; accumulate in f32.
        x = x_ref[...]
        w1 = w1_ref[...]
        h1 = jnp.dot(x.astype(w1.dtype), w1,
                     preferred_element_type=f32) + b1_ref[...]
        h1 = jnp.maximum(h1, 0.2 * h1)     # LeakyReLU(0.2): single VPU max

        # Linear(hidden -> 300 (padded to 384)).
        w2 = w2_ref[...]
        h2 = jnp.dot(h1.astype(w2.dtype), w2,
                     preferred_element_type=f32) + b2_ref[...]

        # BatchNorm1d(300), training mode: batch mean / biased variance,
        # eps=1e-5.  One-pass stats with a >=0 clamp on the variance;
        # gamma/beta folded into one scale/shift FMA sweep; rsqrt -> EUP.
        inv_b = f32(1.0 / h2.shape[0])
        mean = jnp.sum(h2, axis=0, keepdims=True) * inv_b
        mean_sq = jnp.sum(h2 * h2, axis=0, keepdims=True) * inv_b
        var = jnp.maximum(mean_sq - mean * mean, 0.0)
        scale = gamma_ref[...] * jax.lax.rsqrt(var + 1e-5)
        shift = beta_ref[...] - mean * scale
        h2 = h2 * scale + shift
        h2 = jnp.maximum(h2, 0.2 * h2)

        # Linear(300 -> 2*latent); w3 is packed so mu occupies lanes
        # [0, lat_p) and logvar lanes [lat_p, 2*lat_p) -> 128-aligned slices.
        w3 = w3_ref[...]
        q = jnp.dot(h2.astype(w3.dtype), w3,
                    preferred_element_type=f32) + b3_ref[...]
        mu_blk = q[:, :lat_p]
        lv_blk = q[:, lat_p:]

        # reparameterize: z = mu + eps * exp(0.5 * logvar)   (exp -> EUP)
        z_blk = mu_blk + eps_ref[...] * jnp.exp(0.5 * lv_blk)

        if pack_output:
            # Padded lanes are exact zeros, so additive lane-packing at
            # offsets 0 / 32 / 64 is lossless for latent_dim <= 32.  One
            # unmasked 128-lane-wide store; rolls run on the idle XLU slot.
            out_ref[...] = (mu_blk
                            + pltpu.roll(lv_blk, _PACK_STRIDE, axis=1)
                            + pltpu.roll(z_blk, 2 * _PACK_STRIDE, axis=1))
        else:
            out_ref[:, :lat_p] = mu_blk
            out_ref[:, lat_p:2 * lat_p] = lv_blk
            out_ref[:, 2 * lat_p:] = z_blk

    return kernel


# ----------------------------------------------------------------------------
# Parameters (PyTorch-style init, embedded into lane-padded zero arrays)
# ----------------------------------------------------------------------------
def init_params(key, image_size=784, latent_dim=10, hidden_dim=500,
                weight_dtype=jnp.bfloat16):
    f32 = jnp.float32
    in_p = _round_up(image_size, _LANE)
    hid_p = _round_up(hidden_dim, _LANE)
    bn_p = _round_up(_BN_FEATURES, _LANE)
    lat_p = _round_up(latent_dim, _LANE)

    ks = jax.random.split(key, 6)

    def lin(kw, kb, fan_in, fan_out, pad_in, pad_out):
        bound = float(fan_in) ** -0.5
        w = jax.random.uniform(kw, (fan_in, fan_out), f32, -bound, bound)
        b = jax.random.uniform(kb, (1, fan_out), f32, -bound, bound)
        w_p = jnp.zeros((pad_in, pad_out), f32).at[:fan_in, :fan_out].set(w)
        b_p = jnp.zeros((1, pad_out), f32).at[:, :fan_out].set(b)
        return w_p, b_p

    w1, b1 = lin(ks[0], ks[1], image_size, hidden_dim, in_p, hid_p)
    w2, b2 = lin(ks[2], ks[3], hidden_dim, _BN_FEATURES, hid_p, bn_p)

    # Final Linear(300, 2*latent): mu columns -> lane block [0, lat_p),
    # logvar columns -> lane block [lat_p, 2*lat_p).
    bound3 = float(_BN_FEATURES) ** -0.5
    w3_full = jax.random.uniform(ks[4], (_BN_FEATURES, 2 * latent_dim), f32,
                                 -bound3, bound3)
    b3_full = jax.random.uniform(ks[5], (1, 2 * latent_dim), f32, -bound3, bound3)
    w3 = jnp.zeros((bn_p, 2 * lat_p), f32)
    w3 = w3.at[:_BN_FEATURES, :latent_dim].set(w3_full[:, :latent_dim])
    w3 = w3.at[:_BN_FEATURES, lat_p:lat_p + latent_dim].set(w3_full[:, latent_dim:])
    b3 = jnp.zeros((1, 2 * lat_p), f32)
    b3 = b3.at[:, :latent_dim].set(b3_full[:, :latent_dim])
    b3 = b3.at[:, lat_p:lat_p + latent_dim].set(b3_full[:, latent_dim:])

    gamma = jnp.zeros((1, bn_p), f32).at[:, :_BN_FEATURES].set(1.0)
    beta = jnp.zeros((1, bn_p), f32)

    wdt = weight_dtype   # only the big matmul weights change dtype; biases and
                         # gamma/beta stay f32 (v5e-friendly elementwise path)
    return dict(
        w1=w1.astype(wdt), b1=b1,
        w2=w2.astype(wdt), b2=b2,
        gamma=gamma, beta=beta,
        w3=w3.astype(wdt), b3=b3,
        image_size=image_size, latent_dim=latent_dim, hidden_dim=hidden_dim,
    )


# ----------------------------------------------------------------------------
# Wrapper
# ----------------------------------------------------------------------------
def a_encoder_forward(x, params, eps):
    """x: [B, image_size]; eps: [B, latent_dim] standard-normal noise.
    Returns (mu, log_var, z), each [B, latent_dim] float32."""
    f32 = jnp.float32
    B = x.shape[0]
    latent_dim = params["latent_dim"]
    in_p = params["w1"].shape[0]
    hid_p = params["w1"].shape[1]
    bn_p = params["w2"].shape[1]
    lat_p = params["w3"].shape[1] // 2
    wdt = params["w1"].dtype

    # Cast x to the matmul dtype HERE (bf16 weights -> half the x DMA bytes),
    # then zero-pad to the lane-dense feature widths the weights use.
    x_p = x.astype(wdt)
    if x_p.shape[1] != in_p:
        x_p = jnp.pad(x_p, ((0, 0), (0, in_p - x_p.shape[1])))
    eps_p = eps.astype(f32)
    if eps_p.shape[1] != lat_p:
        eps_p = jnp.pad(eps_p, ((0, 0), (0, lat_p - eps_p.shape[1])))

    # Lane-packed single-vreg-wide output when the latent fits 3x into 128
    # lanes at stride 32; otherwise fall back to the 3-block slab.
    pack_output = (latent_dim <= _PACK_STRIDE) and (lat_p == _LANE)
    out_w = _LANE if pack_output else 3 * lat_p

    def nbytes(a):
        return int(a.size) * a.dtype.itemsize

    param_arrays = [params[k] for k in
                    ("w1", "b1", "w2", "b2", "gamma", "beta", "w3", "b3")]
    in_bytes = nbytes(x_p) + nbytes(eps_p) + sum(nbytes(a) for a in param_arrays)
    out_bytes = B * out_w * 4
    flops = 2 * B * (in_p * hid_p + hid_p * bn_p + bn_p * 2 * lat_p)
    cost = pl.CostEstimate(flops=flops,
                           transcendentals=B * lat_p + bn_p,
                           bytes_accessed=in_bytes + out_bytes)

    # Intermediates, including the bf16 cast copies of h1/h2 feeding the MXU.
    cast_isz = jnp.dtype(wdt).itemsize
    interm_bytes = B * (hid_p * (4 + cast_isz)
                        + bn_p * (8 + cast_isz)
                        + 2 * lat_p * 4
                        + out_w * 4)

    # Generation-aware VMEM clamp: ~54 MiB on 64 MiB chips (v7x), up to
    # 100 MiB on 128 MiB chips (v5e / v6e).
    vmem_cap = _vmem_capacity_bytes()
    ceiling = min(int(vmem_cap * 0.85), 100 * 1024 * 1024)
    vmem_limit = int(min(max(2 * (in_bytes + out_bytes + interm_bytes),
                             32 * 1024 * 1024),
                         ceiling))

    vmem = lambda: pl.BlockSpec(memory_space=pltpu.MemorySpace.VMEM)

    out = pl.pallas_call(
        _make_kernel(pack_output),
        out_shape=jax.ShapeDtypeStruct((B, out_w), f32),
        in_specs=[vmem() for _ in range(10)],
        out_specs=vmem(),
        compiler_params=pltpu.CompilerParams(vmem_limit_bytes=vmem_limit),
        cost_estimate=cost,
    )(
        x_p,
        params["w1"], params["b1"],
        params["w2"], params["b2"],
        params["gamma"], params["beta"],
        params["w3"], params["b3"],
        eps_p,
    )

    if pack_output:
        mu = out[:, :latent_dim]
        log_var = out[:, _PACK_STRIDE:_PACK_STRIDE + latent_dim]
        z = out[:, 2 * _PACK_STRIDE:2 * _PACK_STRIDE + latent_dim]
    else:
        mu = out[:, :latent_dim]
        log_var = out[:, lat_p:lat_p + latent_dim]
        z = out[:, 2 * lat_p:2 * lat_p + latent_dim]
    return mu, log_var, z


# ----------------------------------------------------------------------------
# Pure-JAX reference (unpadded weight blocks; padded lanes are exact zeros so
# this is mathematically identical to the kernel's math, modulo bf16 casts).
# ----------------------------------------------------------------------------
def a_encoder_reference(x, params, eps):
    f32 = jnp.float32
    L = params["latent_dim"]
    img, hid, bn = params["image_size"], params["hidden_dim"], _BN_FEATURES
    lat_p = params["w3"].shape[1] // 2

    w1 = params["w1"][:img, :hid].astype(f32); b1 = params["b1"][:, :hid]
    w2 = params["w2"][:hid, :bn].astype(f32);  b2 = params["b2"][:, :bn]
    gamma = params["gamma"][:, :bn];           beta = params["beta"][:, :bn]
    w3 = jnp.concatenate([params["w3"][:bn, :L],
                          params["w3"][:bn, lat_p:lat_p + L]], axis=1).astype(f32)
    b3 = jnp.concatenate([params["b3"][:, :L],
                          params["b3"][:, lat_p:lat_p + L]], axis=1)

    def lrelu(v):
        return jnp.where(v > 0, v, 0.2 * v)

    h1 = lrelu(x @ w1 + b1)
    h2 = h1 @ w2 + b2
    m = h2.mean(0, keepdims=True)
    v = ((h2 - m) ** 2).mean(0, keepdims=True)
    h2 = lrelu((h2 - m) * jax.lax.rsqrt(v + 1e-5) * gamma + beta)
    q = h2 @ w3 + b3
    mu, lv = q[:, :L], q[:, L:]
    return mu, lv, mu + eps * jnp.exp(0.5 * lv)


# ----------------------------------------------------------------------------
if __name__ == "__main__":
    # Small shapes consistent with the module's forward (flattened images).
    B = 8
    IMAGE_SIZE = 64
    HIDDEN_DIM = 32
    LATENT_DIM = 8

    key = jax.random.PRNGKey(0)
    k_x, k_eps, k_p = jax.random.split(key, 3)
    x = jax.random.normal(k_x, (B, IMAGE_SIZE), jnp.float32)
    eps = jax.random.normal(k_eps, (B, LATENT_DIM), jnp.float32)

    # --- f32 weights, tight check against pure-JAX reference ---
    params = init_params(k_p, IMAGE_SIZE, LATENT_DIM, HIDDEN_DIM,
                         weight_dtype=jnp.float32)
    mu, log_var, z = a_encoder_forward(x, params, eps)
    jax.block_until_ready((mu, log_var, z))

    mu_r, lv_r, z_r = a_encoder_reference(x, params, eps)
    assert mu.shape == (B, LATENT_DIM) and log_var.shape == (B, LATENT_DIM)
    assert jnp.allclose(mu, mu_r, atol=1e-4), "mu mismatch (f32)"
    assert jnp.allclose(log_var, lv_r, atol=1e-4), "log_var mismatch (f32)"
    assert jnp.allclose(z, z_r, atol=1e-4), "z mismatch (f32)"

    # --- bf16 weights + bf16 x, f32 accumulation (default / recommended) ---
    params_bf16 = init_params(k_p, IMAGE_SIZE, LATENT_DIM, HIDDEN_DIM,
                              weight_dtype=jnp.bfloat16)
    mu_b, lv_b, z_b = a_encoder_forward(x, params_bf16, eps)
    jax.block_until_ready((mu_b, lv_b, z_b))
    assert jnp.allclose(mu_b, mu_r, atol=1e-1, rtol=1e-1), "mu mismatch (bf16)"
    assert jnp.allclose(lv_b, lv_r, atol=1e-1, rtol=1e-1), "log_var mismatch (bf16)"
    assert jnp.allclose(z_b, z_r, atol=1.5e-1, rtol=1e-1), "z mismatch (bf16)"

    print("KERNEL_OK")
</pallas_src>

<mosaic_0001>
module attributes {stable_mosaic.version = 11 : i64} {
  func.func @kernel(%arg0: memref<8x128xf32, #tpu.memory_space<vmem>>, %arg1: memref<128x128xf32, #tpu.memory_space<vmem>>, %arg2: memref<1x128xf32, #tpu.memory_space<vmem>>, %arg3: memref<128x384xf32, #tpu.memory_space<vmem>>, %arg4: memref<1x384xf32, #tpu.memory_space<vmem>>, %arg5: memref<1x384xf32, #tpu.memory_space<vmem>>, %arg6: memref<1x384xf32, #tpu.memory_space<vmem>>, %arg7: memref<384x256xf32, #tpu.memory_space<vmem>>, %arg8: memref<1x256xf32, #tpu.memory_space<vmem>>, %arg9: memref<8x128xf32, #tpu.memory_space<vmem>>, %arg10: memref<8x128xf32, #tpu.memory_space<vmem>>) attributes {dimension_semantics = [], scalar_prefetch = 0 : i64, scratch_operands = 0 : i64, tpu.core_type = #tpu.core_type<tc>} {
    %c0 = arith.constant 0 : index
    %c0_0 = arith.constant 0 : index
    %0 = vector.load %arg0[%c0, %c0_0] : memref<8x128xf32, #tpu.memory_space<vmem>>, vector<8x128xf32>
    %c0_1 = arith.constant 0 : index
    %c0_2 = arith.constant 0 : index
    %1 = vector.load %arg1[%c0_1, %c0_2] : memref<128x128xf32, #tpu.memory_space<vmem>>, vector<128x128xf32>
    %cst = arith.constant dense<0.000000e+00> : vector<8x128xf32>
    %2 = tpu.matmul %0, %1, %cst {dimension_numbers = #tpu.dot_dimension_numbers<[1], [0], [0], [1], [0, 0, 1, 1], [], []>} : vector<8x128xf32>, vector<128x128xf32>, vector<8x128xf32> -> vector<8x128xf32>
    %c0_3 = arith.constant 0 : index
    %c0_4 = arith.constant 0 : index
    %3 = vector.load %arg2[%c0_3, %c0_4] : memref<1x128xf32, #tpu.memory_space<vmem>>, vector<1x128xf32>
    %4 = vector.broadcast %3 : vector<1x128xf32> to vector<8x128xf32>
    %5 = arith.addf %2, %4 : vector<8x128xf32>
    %cst_5 = arith.constant 2.000000e-01 : f32
    %6 = vector.broadcast %cst_5 : f32 to vector<8x128xf32>
    %7 = arith.mulf %6, %5 : vector<8x128xf32>
    %8 = arith.maximumf %5, %7 : vector<8x128xf32>
    %c0_6 = arith.constant 0 : index
    %c0_7 = arith.constant 0 : index
    %9 = vector.load %arg3[%c0_6, %c0_7] : memref<128x384xf32, #tpu.memory_space<vmem>>, vector<128x384xf32>
    %cst_8 = arith.constant dense<0.000000e+00> : vector<8x384xf32>
    %10 = tpu.matmul %8, %9, %cst_8 {dimension_numbers = #tpu.dot_dimension_numbers<[1], [0], [0], [1], [0, 0, 1, 1], [], []>} : vector<8x128xf32>, vector<128x384xf32>, vector<8x384xf32> -> vector<8x384xf32>
    %c0_9 = arith.constant 0 : index
    %c0_10 = arith.constant 0 : index
    %11 = vector.load %arg4[%c0_9, %c0_10] : memref<1x384xf32, #tpu.memory_space<vmem>>, vector<1x384xf32>
    %12 = vector.broadcast %11 : vector<1x384xf32> to vector<8x384xf32>
    %13 = arith.addf %10, %12 : vector<8x384xf32>
    %cst_11 = arith.constant dense<0.000000e+00> : vector<384xf32>
    %14 = vector.multi_reduction <add>, %13, %cst_11 [0] : vector<8x384xf32> to vector<384xf32>
    %15 = vector.shape_cast %14 : vector<384xf32> to vector<1x384xf32>
    %cst_12 = arith.constant 1.250000e-01 : f32
    %16 = vector.broadcast %cst_12 : f32 to vector<1x384xf32>
    %17 = arith.mulf %15, %16 : vector<1x384xf32>
    %18 = arith.mulf %13, %13 : vector<8x384xf32>
    %cst_13 = arith.constant dense<0.000000e+00> : vector<384xf32>
    %19 = vector.multi_reduction <add>, %18, %cst_13 [0] : vector<8x384xf32> to vector<384xf32>
    %20 = vector.shape_cast %19 : vector<384xf32> to vector<1x384xf32>
    %cst_14 = arith.constant 1.250000e-01 : f32
    %21 = vector.broadcast %cst_14 : f32 to vector<1x384xf32>
    %22 = arith.mulf %20, %21 : vector<1x384xf32>
    %23 = arith.mulf %17, %17 : vector<1x384xf32>
    %24 = arith.subf %22, %23 : vector<1x384xf32>
    %cst_15 = arith.constant 0.000000e+00 : f32
    %25 = vector.broadcast %cst_15 : f32 to vector<1x384xf32>
    %26 = arith.maximumf %24, %25 : vector<1x384xf32>
    %c0_16 = arith.constant 0 : index
    %c0_17 = arith.constant 0 : index
    %27 = vector.load %arg5[%c0_16, %c0_17] : memref<1x384xf32, #tpu.memory_space<vmem>>, vector<1x384xf32>
    %cst_18 = arith.constant 9.99999974E-6 : f32
    %28 = vector.broadcast %cst_18 : f32 to vector<1x384xf32>
    %29 = arith.addf %26, %28 : vector<1x384xf32>
    %30 = math.rsqrt %29 : vector<1x384xf32>
    %31 = arith.mulf %27, %30 : vector<1x384xf32>
    %c0_19 = arith.constant 0 : index
    %c0_20 = arith.constant 0 : index
    %32 = vector.load %arg6[%c0_19, %c0_20] : memref<1x384xf32, #tpu.memory_space<vmem>>, vector<1x384xf32>
    %33 = arith.mulf %17, %31 : vector<1x384xf32>
    %34 = arith.subf %32, %33 : vector<1x384xf32>
    %35 = vector.broadcast %31 : vector<1x384xf32> to vector<8x384xf32>
    %36 = arith.mulf %13, %35 : vector<8x384xf32>
    %37 = vector.broadcast %34 : vector<1x384xf32> to vector<8x384xf32>
    %38 = arith.addf %36, %37 : vector<8x384xf32>
    %cst_21 = arith.constant 2.000000e-01 : f32
    %39 = vector.broadcast %cst_21 : f32 to vector<8x384xf32>
    %40 = arith.mulf %39, %38 : vector<8x384xf32>
    %41 = arith.maximumf %38, %40 : vector<8x384xf32>
    %c0_22 = arith.constant 0 : index
    %c0_23 = arith.constant 0 : index
    %42 = vector.load %arg7[%c0_22, %c0_23] : memref<384x256xf32, #tpu.memory_space<vmem>>, vector<384x256xf32>
    %cst_24 = arith.constant dense<0.000000e+00> : vector<8x256xf32>
    %43 = tpu.matmul %41, %42, %cst_24 {dimension_numbers = #tpu.dot_dimension_numbers<[1], [0], [0], [1], [0, 0, 1, 1], [], []>} : vector<8x384xf32>, vector<384x256xf32>, vector<8x256xf32> -> vector<8x256xf32>
    %c0_25 = arith.constant 0 : index
    %c0_26 = arith.constant 0 : index
    %44 = vector.load %arg8[%c0_25, %c0_26] : memref<1x256xf32, #tpu.memory_space<vmem>>, vector<1x256xf32>
    %45 = vector.broadcast %44 : vector<1x256xf32> to vector<8x256xf32>
    %46 = arith.addf %43, %45 : vector<8x256xf32>
    %47 = vector.extract_strided_slice %46 {offsets = [0, 0], sizes = [8, 128], strides = [1, 1]} : vector<8x256xf32> to vector<8x128xf32>
    %48 = vector.extract_strided_slice %46 {offsets = [0, 128], sizes = [8, 128], strides = [1, 1]} : vector<8x256xf32> to vector<8x128xf32>
    %c0_27 = arith.constant 0 : index
    %c0_28 = arith.constant 0 : index
    %49 = vector.load %arg9[%c0_27, %c0_28] : memref<8x128xf32, #tpu.memory_space<vmem>>, vector<8x128xf32>
    %cst_29 = arith.constant 5.000000e-01 : f32
    %50 = vector.broadcast %cst_29 : f32 to vector<8x128xf32>
    %51 = arith.mulf %50, %48 : vector<8x128xf32>
    %52 = math.exp %51 : vector<8x128xf32>
    %53 = arith.mulf %49, %52 : vector<8x128xf32>
    %54 = arith.addf %47, %53 : vector<8x128xf32>
    %c32_i32 = arith.constant 32 : i32
    %55 = tpu.dynamic_rotate %48 by %c32_i32 dim 1 : vector<8x128xf32>, i32 -> vector<8x128xf32>
    %56 = arith.addf %47, %55 : vector<8x128xf32>
    %c64_i32 = arith.constant 64 : i32
    %57 = tpu.dynamic_rotate %54 by %c64_i32 dim 1 : vector<8x128xf32>, i32 -> vector<8x128xf32>
    %58 = arith.addf %56, %57 : vector<8x128xf32>
    %c0_30 = arith.constant 0 : index
    %c0_31 = arith.constant 0 : index
    %59 = vector.load %arg10[%c0_30, %c0_31] : memref<8x128xf32, #tpu.memory_space<vmem>>, vector<8x128xf32>
    tpu.vector_store %arg10[%c0_30, %c0_31], %58 {strides = array<i32>} : memref<8x128xf32, #tpu.memory_space<vmem>>, vector<8x128xf32>,
    return
  }
}

</mosaic_0001>

<bundles_post_ra>
// kernel: tpu_custom_call.1
= control target key start
LH: loop header
LB: loop body
LE: loop exit
PB: predicated region body
PF: predicated region fallthrough
CT: control target
= control target key end

     0   :  { %15 = vsyncpa [#allocation3], 0  ;;  %s1472_s0 = inlined_call_operand.hbm [shape: f32[8,128], index: 0, kind: input, shape index: {}]   ;;  %s1473_s1 = inlined_call_operand.hbm [shape: f32[128,128], index: 1, kind: input, shape index: {}]   ;;  %s1474_s2 = inlined_call_operand.vmem [shape: f32[1,128], index: 2, kind: input, shape index: {}]   ;;  %s1475_s3 = inlined_call_operand.hbm [shape: f32[128,384], index: 3, kind: input, shape index: {}]   ;;  %s1476_s4 = inlined_call_operand.vmem [shape: f32[1,384], index: 4, kind: input, shape index: {}]   ;;  %s1477_s5 = inlined_call_operand.vmem [shape: f32[1,384], index: 5, kind: input, shape index: {}]   ;;  %s1478_s6 = inlined_call_operand.vmem [shape: f32[1,384], index: 6, kind: input, shape index: {}]   ;;  %s1479_s7 = inlined_call_operand.hbm [shape: f32[384,256], index: 7, kind: input, shape index: {}]   ;;  %s1480_s8 = inlined_call_operand.vmem [shape: f32[1,256], index: 8, kind: input, shape index: {}]   ;;  %s1481_s9 = inlined_call_operand.vmem [shape: f32[8,128], index: 9, kind: input, shape index: {}]   ;;  %s1482_s10 = inlined_call_operand.hbm [shape: f32[8,128], index: 10, kind: output, shape index: {}]  }
   0x1   :  { %16 = vsyncpa [#allocation6], 0 }
   0x2   :  { %17 = vsyncpa [#allocation9], 0 }
   0x3   :  { %18 = vsyncpa [#allocation4], 0  ;;  %s1264_s13 = smov [#allocation5]   ;;  %s1146_s17 = scalar_lea.hbm %s1473_s1, 2048 }
   0x4   :  { %s34_s14 = sshll.u32 %s1264_s13, 4  ;;  %p1147_p0 = scmp.ne.s32.totalorder %s1473_s1, %s1146_s17  ;;  %s35_s14 = int_to_ptr.vmem [resolvable:$true] %s34_s14 }
   0x5   :  { %p1150_p1 = scmp.lt.u32.totalorder %s1146_s17, %s1473_s1 }
   0x7   :  { %p1152_p2 = pnand %p1150_p1, %p1147_p0 }
   0x9   :  { %1155 = shalt.err (!%p1152_p2)
}
   0xa   :  { %s1156_s22 = scalar_lea.vmem %s35_s14, 2048  ;;  %p1161_p4 = scmp.lt.s32.totalorder %s35_s14, %s35_s14 }
   0xb   :  { %p1157_p3 = scmp.ne.s32.totalorder %s35_s14, %s1156_s22  ;;  %p1162_p5 = scmp.lt.s32.totalorder %s1156_s22, %s1156_s22 }
   0xd   :  { %p1163_p6 = por %p1162_p5, %p1161_p4 }
   0xf   :  { %p1164_p7 = pnand %p1163_p6, %p1157_p3 }
  0x11   :  { %1167 = shalt.err (!%p1164_p7)
}
  0x12   :  { %s1265_s23 = smov 128   ;;  %s1266_s24 = smov 8  }
  0x13   :  { %40 = dma.hbm_to_vmem [thread:$0]  %s1473_s1, 2048, %s35_s14, [#allocation6], %s1265_s23, %s1265_s23, %s1266_s24  }
  0x14   :  { %s1267_s27 = smov [#allocation2]   ;;  %s1268_s29 = smov [#allocation7]  }
  0x15   :  { %s25_s28 = sshll.u32 %s1267_s27, 4  ;;  %s48_s30 = sshll.u32 %s1268_s29, 4  ;;  %s26_s28 = int_to_ptr.vmem [resolvable:$true] %s25_s28  ;;  %s49_s30 = int_to_ptr.vmem [resolvable:$true] %s48_s30 }
  0x16   :  { %s1168_s13 = scalar_lea.hbm %s1472_s0, 128 }
  0x17   :  { %p1169_p8 = scmp.ne.s32.totalorder %s1472_s0, %s1168_s13  ;;  %p1172_p9 = scmp.lt.u32.totalorder %s1168_s13, %s1472_s0 }
  0x19   :  { %p1174_p10 = pnand %p1172_p9, %p1169_p8 }
  0x1b   :  { %1177 = shalt.err (!%p1174_p10)
}
  0x1c   :  { %s1178_s1 = scalar_lea.vmem %s26_s28, 128  ;;  %p1183_p12 = scmp.lt.s32.totalorder %s26_s28, %s26_s28 }
  0x1d   :  { %p1179_p11 = scmp.ne.s32.totalorder %s26_s28, %s1178_s1  ;;  %p1184_p13 = scmp.lt.s32.totalorder %s1178_s1, %s1178_s1 }
  0x1f   :  { %p1185_p0 = por %p1184_p13, %p1183_p12 }
  0x21   :  { %p1186_p1 = pnand %p1185_p0, %p1179_p11 }
  0x23   :  { %1189 = shalt.err (!%p1186_p1)
}
  0x24   :  { %28 = dma.hbm_to_vmem [thread:$0]  %s1472_s0, 128, %s26_s28, [#allocation3]  }
  0x25   :  { %s1190_s22 = scalar_lea.hbm %s1475_s3, 6144 }
  0x26   :  { %p1191_p2 = scmp.ne.s32.totalorder %s1475_s3, %s1190_s22  ;;  %p1194_p3 = scmp.lt.u32.totalorder %s1190_s22, %s1475_s3 }
  0x28   :  { %p1196_p4 = pnand %p1194_p3, %p1191_p2 }
  0x2a   :  { %1199 = shalt.err (!%p1196_p4)
}
  0x2b   :  { %s1200_s27 = scalar_lea.vmem %s49_s30, 6144  ;;  %p1205_p6 = scmp.lt.s32.totalorder %s49_s30, %s49_s30 }
  0x2c   :  { %p1201_p5 = scmp.ne.s32.totalorder %s49_s30, %s1200_s27  ;;  %p1206_p7 = scmp.lt.s32.totalorder %s1200_s27, %s1200_s27 }
  0x2e   :  { %p1207_p8 = por %p1206_p7, %p1205_p6 }
  0x30   :  { %p1208_p9 = pnand %p1207_p8, %p1201_p5 }
  0x32   :  { %1211 = shalt.err (!%p1208_p9)
}
  0x33   :  { %s1269_s0 = smov 384   ;;  %s1270_s28 = smov 24  }
  0x34   :  { %54 = dma.hbm_to_vmem [thread:$0]  %s1475_s3, 6144, %s49_s30, [#allocation6], %s1269_s0, %s1269_s0, %s1270_s28  }
  0x35   :  { %s1271_s12 = smov [#allocation8]   ;;  %s1212_s17 = scalar_lea.hbm %s1479_s7, 12288 }
  0x36   :  { %s66_s13 = sshll.u32 %s1271_s12, 4  ;;  %p1213_p10 = scmp.ne.s32.totalorder %s1479_s7, %s1212_s17  ;;  %s67_s13 = int_to_ptr.vmem [resolvable:$true] %s66_s13 }
  0x37   :  { %p1216_p11 = scmp.lt.u32.totalorder %s1212_s17, %s1479_s7 }
  0x39   :  { %p1218_p12 = pnand %p1216_p11, %p1213_p10 }
  0x3b   :  { %1221 = shalt.err (!%p1218_p12)
}
  0x3c   :  { %s1222_s20 = scalar_lea.vmem %s67_s13, 12288  ;;  %p1227_p0 = scmp.lt.s32.totalorder %s67_s13, %s67_s13 }
  0x3d   :  { %p1223_p13 = scmp.ne.s32.totalorder %s67_s13, %s1222_s20  ;;  %p1228_p1 = scmp.lt.s32.totalorder %s1222_s20, %s1222_s20 }
  0x3f   :  { %p1229_p2 = por %p1228_p1, %p1227_p0 }
  0x41   :  { %p1230_p3 = pnand %p1229_p2, %p1223_p13 }
  0x43   :  { %1233 = shalt.err (!%p1230_p3)
}
  0x44   :  { %s1272_s3 = smov 256   ;;  %s1273_s30 = smov 16  }
  0x45   :  { %72 = dma.hbm_to_vmem [thread:$0]  %s1479_s7, 12288, %s67_s13, [#allocation9], %s1272_s3, %s1272_s3, %s1273_s30  }
  0x46   :  { %1256 = dma.done.wait [#allocation3], 128  }
  0x47   :  { %1257 = vsyncadd [#allocation3], 4294967168 }
  0x48   :  { %1258 = dma.done.wait [#allocation6], 8192  }
  0x49   :  { %1259 = vsyncadd [#allocation6], 4294959104 }
  0x4a   :  { %1260 = dma.done.wait [#allocation9], 12288  }
  0x4b   :  { %1261 = vsyncadd [#allocation9], 4294955008  ;;  %v1274_v0 = vmov 0.0|0.0   ;;  %vm1275_vm0 = vmmov 0   ;;  %v1276_v1 = vmov 0.0   ;;  %v90_v2 = vld [vmem:[#allocation5] sm:$0xff] }
  0x4c   :  { %941 = vmatprep.subr.bf16.mxu0 %v1274_v0  ;;  %903 = vmatprep.mubr.msk.f32.mxu0 %vm1275_vm0, %v1276_v1  ;;  %v91_v3 = vld [vmem:[#allocation5 + $0x8] sm:$0xff]  ;;  %v92_v4 = vld [vmem:[#allocation5 + $0x10] sm:$0xff]  ;;  %v93_v6 = vld [vmem:[#allocation5 + $0x18] sm:$0xff]  ;;  %s1278_s0 = smov 32   ;;  %s1280_s11 = smov [#allocation10]  }
  0x4d   :  { %v942_v5 = vpack.c.bf16 %v91_v3, %v90_v2  ;;  %v945_v7 = vpack.c.bf16 %v93_v6, %v92_v4  ;;  %v94_v8 = vld [vmem:[#allocation5 + $0x20] sm:$0xff]  ;;  %v95_v9 = vld [vmem:[#allocation5 + $0x28] sm:$0xff]  ;;  %v96_v11 = vld [vmem:[#allocation5 + $0x30] sm:$0xff]  ;;  %s825_s12 = sshll.u32 %s1280_s11, 4  ;;  %s826_s12 = int_to_ptr.vmem [resolvable:$true] %s825_s12 }
  0x4e   :  { %v948_v10 = vpack.c.bf16 %v95_v9, %v94_v8  ;;  %v97_v12 = vld [vmem:[#allocation5 + $0x38] sm:$0xff]  ;;  %v98_v14 = vld [vmem:[#allocation5 + $0x40] sm:$0xff]  ;;  %v99_v15 = vld [vmem:[#allocation5 + $0x48] sm:$0xff]  ;;  %s1234_s13 = scalar_lea.vmem %s826_s12, 128  ;;  %p1239_p5 = scmp.lt.s32.totalorder %s826_s12, %s826_s12 }
  0x4f   :  { %943 = vmatpush3.bf16.msra.mxu0 %v942_v5  ;;  %v951_v13 = vpack.c.bf16 %v97_v12, %v96_v11  ;;  %v954_v16 = vpack.c.bf16 %v99_v15, %v98_v14  ;;  %v100_v17 = vld [vmem:[#allocation5 + $0x50] sm:$0xff]  ;;  %v101_v18 = vld [vmem:[#allocation5 + $0x58] sm:$0xff]  ;;  %v102_v20 = vld [vmem:[#allocation5 + $0x60] sm:$0xff]  ;;  %p1235_p4 = scmp.ne.s32.totalorder %s826_s12, %s1234_s13  ;;  %p1240_p6 = scmp.lt.s32.totalorder %s1234_s13, %s1234_s13 }
  0x50   :  { %944 = vmatprep.subr.bf16.mxu0 %v1274_v0  ;;  %v957_v19 = vpack.c.bf16 %v101_v18, %v100_v17  ;;  %v103_v21 = vld [vmem:[#allocation5 + $0x68] sm:$0xff]  ;;  %v104_v23 = vld [vmem:[#allocation5 + $0x70] sm:$0xff]  ;;  %v105_v24 = vld [vmem:[#allocation5 + $0x78] sm:$0xff] }
  0x51   :  { %v960_v22 = vpack.c.bf16 %v103_v21, %v102_v20  ;;  %v186_v25 = vld [vmem:[#allocation7 + $0x8] sm:$0xff]  ;;  %v189_v26 = vld [vmem:[#allocation7 + $0x20] sm:$0xff]  ;;  %v963_v27 = vpack.c.bf16 %v105_v24, %v104_v23  ;;  %v188_v30 = vld [vmem:[#allocation7 + $0x18] sm:$0xff]  ;;  %p1241_p7 = por %p1240_p6, %p1239_p5 }
  0x52   :  { %v965_v28 = vpack.c.bf16 %v189_v26, %v186_v25  ;;  %v185_v29 = vld [vmem:[#allocation7] sm:$0xff]  ;;  %v192_v31 = vld [vmem:[#allocation7 + $0x38] sm:$0xff]  ;;  %v195_v32 = vld [vmem:[#allocation7 + $0x50] sm:$0xff] }
  0x53   :  { %946 = vmatpush3.bf16.msra.mxu0 %v945_v7  ;;  %v89_v33 = vld [vmem:[#allocation2] sm:$0xff]  ;;  %v967_v34 = vpack.c.bf16 %v188_v30, %v185_v29  ;;  %v969_v35 = vpack.c.bf16 %v195_v32, %v192_v31  ;;  %v191_v36 = vld [vmem:[#allocation7 + $0x30] sm:$0xff]  ;;  %v194_v37 = vld [vmem:[#allocation7 + $0x48] sm:$0xff]  ;;  %p1242_p8 = pnand %p1241_p7, %p1235_p4 }
  0x54   :  { %947 = vmatprep.subr.bf16.mxu0 %v1274_v0  ;;  %v198_v38 = vld [vmem:[#allocation7 + $0x68] sm:$0xff]  ;;  %v201_v39 = vld [vmem:[#allocation7 + $0x80] sm:$0xff]  ;;  %v971_v40 = vpack.c.bf16 %v194_v37, %v191_v36  ;;  %v200_v43 = vld [vmem:[#allocation7 + $0x78] sm:$0xff] }
  0x55   :  { %v973_v41 = vpack.c.bf16 %v201_v39, %v198_v38  ;;  %v197_v42 = vld [vmem:[#allocation7 + $0x60] sm:$0xff]  ;;  %v204_v44 = vld [vmem:[#allocation7 + $0x98] sm:$0xff]  ;;  %v207_v45 = vld [vmem:[#allocation7 + $0xb0] sm:$0xff] }
  0x56   :  { %v975_v46 = vpack.c.bf16 %v200_v43, %v197_v42  ;;  %v977_v47 = vpack.c.bf16 %v207_v45, %v204_v44  ;;  %v203_v48 = vld [vmem:[#allocation7 + $0x90] sm:$0xff]  ;;  %v206_v49 = vld [vmem:[#allocation7 + $0xa8] sm:$0xff]  ;;  %v213_v51 = vld [vmem:[#allocation7 + $0xe0] sm:$0xff] }
  0x57   :  { %949 = vmatpush3.bf16.msra.mxu0 %v948_v10  ;;  %v210_v50 = vld [vmem:[#allocation7 + $0xc8] sm:$0xff]  ;;  %v979_v52 = vpack.c.bf16 %v206_v49, %v203_v48  ;;  %v209_v54 = vld [vmem:[#allocation7 + $0xc0] sm:$0xff]  ;;  %v212_v55 = vld [vmem:[#allocation7 + $0xd8] sm:$0xff] }
  0x58   :  { %950 = vmatprep.subr.bf16.mxu0 %v1274_v0  ;;  %v981_v53 = vpack.c.bf16 %v213_v51, %v210_v50  ;;  %v216_v56 = vld [vmem:[#allocation7 + $0xf8] sm:$0xff]  ;;  %v219_v57 = vld [vmem:[#allocation7 + $0x110] sm:$0xff]  ;;  %v983_v58 = vpack.c.bf16 %v212_v55, %v209_v54  ;;  %v218_v61 = vld [vmem:[#allocation7 + $0x108] sm:$0xff] }
  0x59   :  { %v985_v59 = vpack.c.bf16 %v219_v57, %v216_v56  ;;  %v215_v60 = vld [vmem:[#allocation7 + $0xf0] sm:$0xff]  ;;  %v222_v62 = vld [vmem:[#allocation7 + $0x128] sm:$0xff]  ;;  %v225_v63 = vld [vmem:[#allocation7 + $0x140] sm:$0xff] }
  0x5a   :  { %v987_v2 = vpack.c.bf16 %v218_v61, %v215_v60  ;;  %v989_v3 = vpack.c.bf16 %v225_v63, %v222_v62  ;;  %v221_v4 = vld [vmem:[#allocation7 + $0x120] sm:$0xff]  ;;  %v224_v5 = vld [vmem:[#allocation7 + $0x138] sm:$0xff]  ;;  %v231_v8 = vld [vmem:[#allocation7 + $0x170] sm:$0xff] }
  0x5b   :  { %952 = vmatpush3.bf16.msra.mxu0 %v951_v13  ;;  %v991_v6 = vpack.c.bf16 %v224_v5, %v221_v4  ;;  %v228_v7 = vld [vmem:[#allocation7 + $0x158] sm:$0xff]  ;;  %v227_v10 = vld [vmem:[#allocation7 + $0x150] sm:$0xff]  ;;  %v230_v11 = vld [vmem:[#allocation7 + $0x168] sm:$0xff] }
  0x5c   :  { %953 = vmatprep.subr.bf16.mxu0 %v1274_v0  ;;  %v993_v9 = vpack.c.bf16 %v231_v8, %v228_v7  ;;  %v995_v12 = vpack.c.bf16 %v230_v11, %v227_v10  ;;  %v836_v13 = vld [vmem:[%s1474_s2] ss:$0 sm:$0xff]  ;;  %v187_v17 = vld [vmem:[#allocation7 + $0x10] sm:$0xff]  ;;  %v190_v18 = vld [vmem:[#allocation7 + $0x28] sm:$0xff] }
  0x5d   :  { %v998_v20 = vpack.c.bf16 %v190_v18, %v187_v17  ;;  %v196_v23 = vld [vmem:[#allocation7 + $0x58] sm:$0xff]  ;;  %v199_v25 = vld [vmem:[#allocation7 + $0x70] sm:$0xff]  ;;  %v202_v26 = vld [vmem:[#allocation7 + $0x88] sm:$0xff] }
  0x5e   :  { %v208_v29 = vld [vmem:[#allocation7 + $0xb8] sm:$0xff]  ;;  %v211_v31 = vld [vmem:[#allocation7 + $0xd0] sm:$0xff]  ;;  %v214_v32 = vld [vmem:[#allocation7 + $0xe8] sm:$0xff] }
  0x5f   :  { %955 = vmatpush3.bf16.msra.mxu0 %v954_v16  ;;  %v223_v37 = vld [vmem:[#allocation7 + $0x130] sm:$0xff]  ;;  %v226_v38 = vld [vmem:[#allocation7 + $0x148] sm:$0xff]  ;;  %v559_v44 = vld [vmem:[#allocation8 + $0x18] sm:$0xff] }
  0x60   :  { %956 = vmatprep.subr.bf16.mxu0 %v1274_v0  ;;  %v1016_v39 = vpack.c.bf16 %v226_v38, %v223_v37  ;;  %v557_v43 = vld [vmem:[#allocation8 + $0x8] sm:$0xff]  ;;  %v563_v50 = vld [vmem:[#allocation8 + $0x38] sm:$0xff]  ;;  %v564_v57 = vld [vmem:[#allocation8 + $0x40] sm:$0xff] }
  0x61   :  { %v1021_v45 = vpack.c.bf16 %v559_v44, %v557_v43  ;;  %v561_v49 = vld [vmem:[#allocation8 + $0x28] sm:$0xff]  ;;  %v571_v61 = vld [vmem:[#allocation8 + $0x78] sm:$0xff]  ;;  %v568_v63 = vld [vmem:[#allocation8 + $0x60] sm:$0xff] }
  0x62   :  { %v1025_v51 = vpack.c.bf16 %v563_v50, %v561_v49  ;;  %v565_v55 = vld [vmem:[#allocation8 + $0x48] sm:$0xff]  ;;  %v575_v5 = vld [vmem:[#allocation8 + $0x98] sm:$0xff]  ;;  %v572_v7 = vld [vmem:[#allocation8 + $0x80] sm:$0xff] }
  0x63   :  { %958 = vmatpush3.bf16.msra.mxu0 %v957_v19  ;;  %1022 = vmatprep.subr.bf16.mxu1 %v1021_v45  ;;  %v569_v60 = vld [vmem:[#allocation8 + $0x68] sm:$0xff]  ;;  %v574_v8 = vld [vmem:[#allocation8 + $0x90] sm:$0xff]  ;;  %v579_v11 = vld [vmem:[#allocation8 + $0xb8] sm:$0xff] }
  0x64   :  { %959 = vmatprep.subr.bf16.mxu0 %v1274_v0  ;;  %v1033_v62 = vpack.c.bf16 %v571_v61, %v569_v60  ;;  %v573_v4 = vld [vmem:[#allocation8 + $0x88] sm:$0xff]  ;;  %v583_v17 = vld [vmem:[#allocation8 + $0xd8] sm:$0xff]  ;;  %v592_v37 = vld [vmem:[#allocation8 + $0x120] sm:$0xff] }
  0x65   :  { %v577_v10 = vld [vmem:[#allocation8 + $0xa8] sm:$0xff]  ;;  %v594_v38 = vld [vmem:[#allocation8 + $0x130] sm:$0xff]  ;;  %v596_v43 = vld [vmem:[#allocation8 + $0x140] sm:$0xff] }
  0x66   :  { %v598_v44 = vld [vmem:[#allocation8 + $0x150] sm:$0xff]  ;;  %v600_v49 = vld [vmem:[#allocation8 + $0x160] sm:$0xff] }
  0x67   :  { %961 = vmatpush3.bf16.msra.mxu0 %v960_v22  ;;  %v193_v22 = vld [vmem:[#allocation7 + $0x40] sm:$0xff]  ;;  %v1063_v45 = vpack.c.bf16 %v598_v44, %v596_v43  ;;  %v602_v50 = vld [vmem:[#allocation8 + $0x170] sm:$0xff] }
  0x68   :  { %962 = vmatprep.subr.bf16.mxu0 %v1274_v0  ;;  %v1001_v24 = vpack.c.bf16 %v196_v23, %v193_v22  ;;  %v585_v22 = vld [vmem:[#allocation8 + $0xe8] sm:$0xff]  ;;  %v587_v23 = vld [vmem:[#allocation8 + $0xf8] sm:$0xff]  ;;  %v608_v60 = vld [vmem:[#allocation8 + $0x1a0] sm:$0xff] }
  0x69   :  { %v610_v61 = vld [vmem:[#allocation8 + $0x1b0] sm:$0xff] }
  0x6b   :  { %964 = vmatpush3.bf16.msra.mxu0 %v963_v27  ;;  %v1004_v27 = vpack.c.bf16 %v202_v26, %v199_v25  ;;  %v584_v25 = vld [vmem:[#allocation8 + $0xe0] sm:$0xff]  ;;  %v586_v26 = vld [vmem:[#allocation8 + $0xf0] sm:$0xff] }
  0x6c   :  { %966 = vmatprep.subr.bf16.mxu0 %v965_v28  ;;  %v205_v28 = vld [vmem:[#allocation7 + $0xa0] sm:$0xff] }
  0x6d   :  { %v1007_v30 = vpack.c.bf16 %v208_v29, %v205_v28  ;;  %v589_v28 = vld [vmem:[#allocation8 + $0x108] sm:$0xff]  ;;  %v591_v29 = vld [vmem:[#allocation8 + $0x118] sm:$0xff] }
  0x6e   :  { %904 = vmatmul.mubr.f32.vlgmr.msra.gmra.mrb[0].mxu0 %v89_v33  ;;  %v1010_v33 = vpack.c.bf16 %v214_v32, %v211_v31  ;;  %v588_v31 = vld [vmem:[#allocation8 + $0x100] sm:$0xff]  ;;  %v590_v32 = vld [vmem:[#allocation8 + $0x110] sm:$0xff] }
  0x6f   :  { %968 = vmatpush1.bf16.msra.mxu0 %v967_v34  ;;  %314 = vmatprep.mubr.f32.mxu0 %v1276_v1  ;;  %v217_v34 = vld [vmem:[#allocation7 + $0x100] sm:$0xff] }
  0x70   :  { %970 = vmatprep.subr.bf16.mxu0 %v969_v35  ;;  %v220_v35 = vld [vmem:[#allocation7 + $0x118] sm:$0xff] }
  0x71   :  { %v1013_v36 = vpack.c.bf16 %v220_v35, %v217_v34  ;;  %v593_v34 = vld [vmem:[#allocation8 + $0x128] sm:$0xff]  ;;  %v595_v35 = vld [vmem:[#allocation8 + $0x138] sm:$0xff] }
  0x73   :  { %972 = vmatpush1.bf16.msra.mxu0 %v971_v40  ;;  %v229_v40 = vld [vmem:[#allocation7 + $0x160] sm:$0xff] }
  0x74   :  { %974 = vmatprep.subr.bf16.mxu0 %v973_v41  ;;  %v232_v41 = vld [vmem:[#allocation7 + $0x178] sm:$0xff] }
  0x75   :  { %v1019_v42 = vpack.c.bf16 %v232_v41, %v229_v40  ;;  %v597_v40 = vld [vmem:[#allocation8 + $0x148] sm:$0xff]  ;;  %v599_v41 = vld [vmem:[#allocation8 + $0x158] sm:$0xff] }
  0x77   :  { %976 = vmatpush1.bf16.msra.mxu0 %v975_v46  ;;  %v556_v46 = vld [vmem:[#allocation8] sm:$0xff] }
  0x78   :  { %978 = vmatprep.subr.bf16.mxu0 %v977_v47  ;;  %v558_v47 = vld [vmem:[#allocation8 + $0x10] sm:$0xff] }
  0x79   :  { %v1023_v48 = vpack.c.bf16 %v558_v47, %v556_v46  ;;  %v601_v46 = vld [vmem:[#allocation8 + $0x168] sm:$0xff]  ;;  %v603_v47 = vld [vmem:[#allocation8 + $0x178] sm:$0xff] }
  0x7b   :  { %980 = vmatpush1.bf16.msra.mxu0 %v979_v52  ;;  %1024 = vmatpush1.bf16.msra.mxu1 %v1023_v48  ;;  %v560_v52 = vld [vmem:[#allocation8 + $0x20] sm:$0xff]  ;;  %v1065_v48 = vpack.c.bf16 %v603_v47, %v601_v46 }
  0x7c   :  { %982 = vmatprep.subr.bf16.mxu0 %v981_v53  ;;  %v562_v53 = vld [vmem:[#allocation8 + $0x30] sm:$0xff]  ;;  %1026 = vmatprep.subr.bf16.mxu1 %v1025_v51  ;;  %v1067_v51 = vpack.c.bf16 %v602_v50, %v600_v49 }
  0x7d   :  { %v1027_v54 = vpack.c.bf16 %v562_v53, %v560_v52  ;;  %v605_v52 = vld [vmem:[#allocation8 + $0x188] sm:$0xff]  ;;  %v607_v53 = vld [vmem:[#allocation8 + $0x198] sm:$0xff] }
  0x7f   :  { %984 = vmatpush1.bf16.msra.mxu0 %v983_v58  ;;  %1028 = vmatpush1.bf16.msra.mxu1 %v1027_v54  ;;  %v566_v58 = vld [vmem:[#allocation8 + $0x50] sm:$0xff]  ;;  %v604_v54 = vld [vmem:[#allocation8 + $0x180] sm:$0xff] }
  0x80   :  { %986 = vmatprep.subr.bf16.mxu0 %v985_v59  ;;  %v1031_v59 = vpack.c.bf16 %v566_v58, %v564_v57  ;;  %v611_v57 = vld [vmem:[#allocation8 + $0x1b8] sm:$0xff] }
  0x83   :  { %988 = vmatpush1.bf16.msra.mxu0 %v987_v2  ;;  %v570_v2 = vld [vmem:[#allocation8 + $0x70] sm:$0xff] }
  0x84   :  { %990 = vmatprep.subr.bf16.mxu0 %v989_v3  ;;  %v1035_v3 = vpack.c.bf16 %v570_v2, %v568_v63  ;;  %v615_v63 = vld [vmem:[#allocation8 + $0x1d8] sm:$0xff]  ;;  %v1075_v2 = vpack.c.bf16 %v610_v61, %v608_v60 }
  0x87   :  { %992 = vmatpush1.bf16.msra.mxu0 %v991_v6  ;;  %v1037_v6 = vpack.c.bf16 %v575_v5, %v573_v4  ;;  %v612_v4 = vld [vmem:[#allocation8 + $0x1c0] sm:$0xff]  ;;  %v614_v5 = vld [vmem:[#allocation8 + $0x1d0] sm:$0xff] }
  0x88   :  { %994 = vmatprep.subr.bf16.mxu0 %v993_v9  ;;  %v1039_v9 = vpack.c.bf16 %v574_v8, %v572_v7  ;;  %v619_v7 = vld [vmem:[#allocation8 + $0x1f8] sm:$0xff]  ;;  %v1079_v8 = vpack.c.bf16 %v614_v5, %v612_v4 }
  0x8b   :  { %996 = vmatpush1.bf16.msra.mxu0 %v995_v12  ;;  %v1041_v12 = vpack.c.bf16 %v579_v11, %v577_v10  ;;  %v616_v10 = vld [vmem:[#allocation8 + $0x1e0] sm:$0xff]  ;;  %v618_v11 = vld [vmem:[#allocation8 + $0x1f0] sm:$0xff] }
  0x8c   :  { %997 = vmatprep.subr.bf16.mxu0 %v1274_v0 }
 0x141   :  { %v179_v14 = vpop.f32.mrb[0].mxu0 }
 0x142   :  { %v180_v15 = vadd.f32 %v836_v13, %v179_v14  ;;  %v905_v16 = vpop.f32.mrb[1].mxu0  ;;  %v576_v13 = vld [vmem:[#allocation8 + $0xa0] sm:$0xff]  ;;  %v578_v14 = vld [vmem:[#allocation8 + $0xb0] sm:$0xff] }
 0x143   :  { %v581_v16 = vld [vmem:[#allocation8 + $0xc8] sm:$0xff] }
 0x144   :  { %v183_v19 = vmul.f32 0.2, %v180_v15  ;;  %v1045_v18 = vpack.c.bf16 %v583_v17, %v581_v16  ;;  %v235_v16 = vlaneseq }
 0x146   :  { %v184_v21 = vmax.f32 %v180_v15, %v183_v19  ;;  %v1043_v15 = vpack.c.bf16 %v578_v14, %v576_v13  ;;  %v580_v19 = vld [vmem:[#allocation8 + $0xc0] sm:$0xff]  ;;  %v621_v13 = vld [vmem:[#allocation8 + $0x208] sm:$0xff]  ;;  %v623_v14 = vld [vmem:[#allocation8 + $0x218] sm:$0xff]  ;;  %v1408_v17 = vshrl.u32 %v235_v16, 7 }
 0x148   :  { %315 = vmatmul.mubr.f32.vlgmr.msra.gmra.mrb[2].mxu0 %v184_v21 }
 0x149   :  { %999 = vmatpush3.bf16.msra.mxu0 %v998_v20  ;;  %938 = vmatprep.mubr.msk.f32.mxu0 %vm1275_vm0, %v1276_v1  ;;  %v582_v20 = vld [vmem:[#allocation8 + $0xd0] sm:$0xff] }
 0x14a   :  { %1000 = vmatprep.subr.bf16.mxu0 %v1274_v0 }
 0x14d   :  { %1002 = vmatpush3.bf16.msra.mxu0 %v1001_v24  ;;  %v1049_v24 = vpack.c.bf16 %v587_v23, %v585_v22 }
 0x14e   :  { %1003 = vmatprep.subr.bf16.mxu0 %v1274_v0 }
 0x151   :  { %1005 = vmatpush3.bf16.msra.mxu0 %v1004_v27  ;;  %v1051_v27 = vpack.c.bf16 %v586_v26, %v584_v25 }
 0x152   :  { %1006 = vmatprep.subr.bf16.mxu0 %v1274_v0 }
 0x155   :  { %1008 = vmatpush3.bf16.msra.mxu0 %v1007_v30  ;;  %v1053_v30 = vpack.c.bf16 %v591_v29, %v589_v28 }
 0x156   :  { %1009 = vmatprep.subr.bf16.mxu0 %v1274_v0 }
 0x159   :  { %1011 = vmatpush3.bf16.msra.mxu0 %v1010_v33  ;;  %v1055_v33 = vpack.c.bf16 %v590_v32, %v588_v31 }
 0x15a   :  { %1012 = vmatprep.subr.bf16.mxu0 %v1274_v0 }
 0x15d   :  { %1014 = vmatpush3.bf16.msra.mxu0 %v1013_v36  ;;  %v1057_v36 = vpack.c.bf16 %v595_v35, %v593_v34 }
 0x15e   :  { %1015 = vmatprep.subr.bf16.mxu0 %v1274_v0 }
 0x161   :  { %1017 = vmatpush3.bf16.msra.mxu0 %v1016_v39  ;;  %v1059_v39 = vpack.c.bf16 %v594_v38, %v592_v37 }
 0x162   :  { %1018 = vmatprep.subr.bf16.mxu0 %v1274_v0  ;;  %v567_v0 = vld [vmem:[#allocation8 + $0x58] sm:$0xff] }
 0x163   :  { %v1029_v56 = vpack.c.bf16 %v567_v0, %v565_v55  ;;  %v1069_v55 = vpack.c.bf16 %v607_v53, %v605_v52  ;;  %v606_v0 = vld [vmem:[#allocation8 + $0x190] sm:$0xff] }
 0x164   :  { %v1071_v58 = vpack.c.bf16 %v606_v0, %v604_v54 }
 0x165   :  { %1020 = vmatpush3.bf16.msra.mxu0 %v1019_v42  ;;  %1030 = vmatprep.subr.bf16.mxu1 %v1029_v56  ;;  %v1061_v42 = vpack.c.bf16 %v599_v41, %v597_v40  ;;  %v609_v56 = vld [vmem:[#allocation8 + $0x1a8] sm:$0xff] }
 0x166   :  { %1032 = vmatpush1.bf16.msra.mxu1 %v1031_v59  ;;  %v1073_v59 = vpack.c.bf16 %v611_v57, %v609_v56 }
 0x167   :  { %1034 = vmatprep.subr.bf16.mxu1 %v1033_v62  ;;  %v613_v62 = vld [vmem:[#allocation8 + $0x1c8] sm:$0xff] }
 0x168   :  { %939 = vmatmul.mubr.f32.vlgmr.msra.gmra.mrb[4].mxu0 %v184_v21  ;;  %v1047_v21 = vpack.c.bf16 %v582_v20, %v580_v19  ;;  %v233_v19 = vld [vmem:[%s1476_s4] sm:$0x7]  ;;  %v1417_v20 = vsub.s32 1, %v1408_v17 }
 0x16a   :  { %1036 = vmatpush1.bf16.msra.mxu1 %v1035_v3  ;;  %v1077_v3 = vpack.c.bf16 %v615_v63, %v613_v62  ;;  %v242_v22 = vrot.slane %v233_v19, %v1417_v20 }
 0x16b   :  { %1038 = vmatprep.subr.bf16.mxu1 %v1037_v6  ;;  %v617_v6 = vld [vmem:[#allocation8 + $0x1e8] sm:$0xff] }
 0x16e   :  { %1040 = vmatpush1.bf16.msra.mxu1 %v1039_v9  ;;  %v1081_v9 = vpack.c.bf16 %v619_v7, %v617_v6 }
 0x16f   :  { %1042 = vmatprep.subr.bf16.mxu1 %v1041_v12  ;;  %v1083_v12 = vpack.c.bf16 %v618_v11, %v616_v10 }
 0x172   :  { %1044 = vmatpush1.bf16.msra.mxu1 %v1043_v15  ;;  %v1085_v15 = vpack.c.bf16 %v623_v14, %v621_v13 }
 0x173   :  { %1046 = vmatprep.subr.bf16.mxu1 %v1045_v18  ;;  %v1411_v18 = vsub.s32 0, %v1408_v17 }
 0x176   :  { %1048 = vmatpush1.bf16.msra.mxu1 %v1047_v21  ;;  %v238_v21 = vrot.slane %v233_v19, %v1411_v18 }
 0x177   :  { %1050 = vmatprep.subr.bf16.mxu1 %v1049_v24 }
 0x17a   :  { %1052 = vmatpush1.bf16.msra.mxu1 %v1051_v27 }
 0x17b   :  { %1054 = vmatprep.subr.bf16.mxu1 %v1053_v30 }
 0x17e   :  { %1056 = vmatpush1.bf16.msra.mxu1 %v1055_v33 }
 0x17f   :  { %1058 = vmatprep.subr.bf16.mxu1 %v1057_v36 }
 0x182   :  { %1060 = vmatpush1.bf16.msra.mxu1 %v1059_v39 }
 0x183   :  { %1062 = vmatprep.subr.bf16.mxu1 %v1061_v42 }
 0x186   :  { %1064 = vmatpush1.bf16.msra.mxu1 %v1063_v45 }
 0x187   :  { %1066 = vmatprep.subr.bf16.mxu1 %v1065_v48 }
 0x18a   :  { %1068 = vmatpush1.bf16.msra.mxu1 %v1067_v51 }
 0x18b   :  { %1070 = vmatprep.subr.bf16.mxu1 %v1069_v55 }
 0x18e   :  { %1072 = vmatpush1.bf16.msra.mxu1 %v1071_v58 }
 0x18f   :  { %1074 = vmatprep.subr.bf16.mxu1 %v1073_v59 }
 0x192   :  { %1076 = vmatpush1.bf16.msra.mxu1 %v1075_v2  ;;  %v245_v2 = vsub.s32 2, %v1408_v17 }
 0x193   :  { %1078 = vmatprep.subr.bf16.mxu1 %v1077_v3 }
 0x194   :  { %v246_v3 = vrot.slane %v233_v19, %v245_v2 }
 0x196   :  { %1080 = vmatpush1.bf16.msra.mxu1 %v1079_v8 }
 0x197   :  { %1082 = vmatprep.subr.bf16.mxu1 %v1081_v9 }
 0x19a   :  { %1084 = vmatpush1.bf16.msra.mxu1 %v1083_v12 }
 0x19b   :  { %1086 = vmatprep.subr.bf16.mxu1 %v1085_v15 }
 0x21b   :  { %v316_v23 = vpop.f32.mrb[2].mxu0 }
 0x21c   :  { %v1421_v24 = vadd.f32 %v316_v23, %v238_v21  ;;  %v318_v25 = vpop.f32.mrb[3].mxu0 }
 0x21d   :  { %v1423_v26 = vadd.f32 %v318_v25, %v242_v22 }
 0x21e   :  { %v391_v27 = vrot.slane %v1421_v24, 4  ;;  %v412_v28 = vmul.f32 %v1421_v24, %v1421_v24 }
 0x21f   :  { %v397_v29 = vrot.slane %v1423_v26, 4  ;;  %v413_v30 = vmul.f32 %v1423_v26, %v1423_v26 }
 0x220   :  { %v392_v31 = vadd.f32 %v391_v27, %v1421_v24  ;;  %v415_v32 = vrot.slane %v412_v28, 4 }
 0x221   :  { %v398_v33 = vadd.f32 %v397_v29, %v1423_v26  ;;  %v421_v34 = vrot.slane %v413_v30, 4 }
 0x222   :  { %v393_v35 = vrot.slane %v392_v31, 2  ;;  %v416_v36 = vadd.f32 %v415_v32, %v412_v28 }
 0x223   :  { %v399_v37 = vrot.slane %v398_v33, 2  ;;  %v422_v38 = vadd.f32 %v421_v34, %v413_v30  ;;  %v1277_v34 = vmov 1966171168  }
 0x224   :  { %v394_v39 = vadd.f32 %v393_v35, %v392_v31  ;;  %v417_v40 = vrot.slane %v416_v36, 2  ;;  %v457_v35 = vunpack.c.l.s4 %v1277_v34  ;;  %v636_v34 = vld [vmem:[#allocation8 + $0x280] sm:$0xff] }
 0x225   :  { %v400_v41 = vadd.f32 %v399_v37, %v398_v33  ;;  %v423_v42 = vrot.slane %v422_v38, 2 }
 0x226   :  { %v395_v43 = vrot.slane %v394_v39, 1  ;;  %v418_v44 = vadd.f32 %v417_v40, %v416_v36  ;;  %v458_v36 = vunpack.c.0.s8 %v457_v35  ;;  %v641_v35 = vld [vmem:[#allocation8 + $0x2a8] sm:$0xff] }
 0x227   :  { %v401_v45 = vrot.slane %v400_v41, 1  ;;  %v424_v46 = vadd.f32 %v423_v42, %v422_v38  ;;  %v445_v42 = vld [vmem:[%s1477_s5] sm:$0x7] }
 0x228   :  { %v396_v47 = vadd.f32 %v395_v43, %v394_v39  ;;  %v419_v48 = vrot.slane %v418_v44, 1  ;;  %v461_v37 = vsub.s32 %v458_v36, %v1408_v17  ;;  %v643_v36 = vld [vmem:[#allocation8 + $0x2b8] sm:$0xff] }
 0x229   :  { %v402_v49 = vadd.f32 %v401_v45, %v400_v41  ;;  %v425_v50 = vrot.slane %v424_v46, 1 }
 0x22a   :  { %v409_v51 = vmul.f32 0.125, %v396_v47  ;;  %v420_v52 = vadd.f32 %v419_v48, %v418_v44 }
 0x22b   :  { %v410_v53 = vmul.f32 0.125, %v402_v49  ;;  %v426_v54 = vadd.f32 %v425_v50, %v424_v46 }
 0x22c   :  { %v433_v55 = vmul.f32 0.125, %v420_v52  ;;  %v436_v0 = vmul.f32 %v409_v51, %v409_v51 }
 0x22d   :  { %v434_v56 = vmul.f32 0.125, %v426_v54  ;;  %v437_v57 = vmul.f32 %v410_v53, %v410_v53 }
 0x22e   :  { %v439_v58 = vsub.f32 %v433_v55, %v436_v0 }
 0x22f   :  { %v440_v59 = vsub.f32 %v434_v56, %v437_v57 }
 0x230   :  { %v442_v60 = vmax.f32 %v439_v58, 0.0  ;;  %v480_v58 = vld [vmem:[%s1478_s6] sm:$0x7] }
 0x231   :  { %v443_v61 = vmax.f32 %v440_v59, 0.0 }
 0x232   :  { %v446_v62 = vadd.f32 1e-05, %v442_v60 }
 0x233   :  { %v447_v63 = vadd.f32 1e-05, %v443_v61 }
 0x234   :  { %1138 = vrsqrt.f32 %v446_v62 }
 0x235   :  { %1140 = vrsqrt.f32 %v447_v63 }
 0x23b   :  { %v387_v4 = vpop.f32.mrb[4].mxu0 }
 0x23c   :  { %v388_v5 = vadd.f32 %v387_v4, %v246_v3  ;;  %v940_v6 = vpop.f32.mrb[5].mxu0  ;;  %v622_v3 = vld [vmem:[#allocation8 + $0x210] sm:$0xff] }
 0x23d   :  { %v625_v6 = vld [vmem:[#allocation8 + $0x228] sm:$0xff] }
 0x23e   :  { %v1139_v7 = vpop.eup %1138  ;;  %v403_v8 = vrot.slane %v388_v5, 4  ;;  %v414_v9 = vmul.f32 %v388_v5, %v388_v5 }
 0x23f   :  { %v1141_v10 = vpop.eup %1140 }
 0x240   :  { %v404_v11 = vadd.f32 %v403_v8, %v388_v5  ;;  %v427_v12 = vrot.slane %v414_v9, 4  ;;  %v455_v13 = vcombine.low %v1139_v7, %v1141_v10  ;;  %v627_v7 = vld [vmem:[#allocation8 + $0x238] sm:$0xff] }
 0x242   :  { %v405_v14 = vrot.slane %v404_v11, 2  ;;  %v428_v15 = vadd.f32 %v427_v12, %v414_v9  ;;  %v462_v39 = vrot.slane %v455_v13, %v461_v37  ;;  %v624_v12 = vld [vmem:[#allocation8 + $0x220] sm:$0xff]  ;;  %v626_v13 = vld [vmem:[#allocation8 + $0x230] sm:$0xff] }
 0x244   :  { %v406_v16 = vadd.f32 %v405_v14, %v404_v11  ;;  %v429_v21 = vrot.slane %v428_v15, 2  ;;  %v1089_v11 = vpack.c.bf16 %v627_v7, %v625_v6  ;;  %v629_v14 = vld [vmem:[#allocation8 + $0x248] sm:$0xff] }
 0x246   :  { %v407_v22 = vrot.slane %v406_v16, 1  ;;  %v430_v23 = vadd.f32 %v429_v21, %v428_v15  ;;  %v631_v15 = vld [vmem:[#allocation8 + $0x258] sm:$0xff]  ;;  %v628_v21 = vld [vmem:[#allocation8 + $0x240] sm:$0xff] }
 0x248   :  { %v408_v25 = vadd.f32 %v407_v22, %v406_v16  ;;  %v431_v27 = vrot.slane %v430_v23, 1  ;;  %v1093_v16 = vpack.c.bf16 %v631_v15, %v629_v14  ;;  %v630_v22 = vld [vmem:[#allocation8 + $0x250] sm:$0xff] }
 0x24a   :  { %v411_v28 = vmul.f32 0.125, %v408_v25  ;;  %v432_v19 = vadd.f32 %v431_v27, %v430_v23  ;;  %v633_v23 = vld [vmem:[#allocation8 + $0x268] sm:$0xff]  ;;  %v635_v25 = vld [vmem:[#allocation8 + $0x278] sm:$0xff]  ;;  %v1095_v27 = vpack.c.bf16 %v630_v22, %v628_v21 }
 0x24c   :  { %v435_v29 = vmul.f32 0.125, %v432_v19  ;;  %v438_v30 = vmul.f32 %v411_v28, %v411_v28  ;;  %v632_v19 = vld [vmem:[#allocation8 + $0x260] sm:$0xff] }
 0x24e   :  { %v441_v31 = vsub.f32 %v435_v29, %v438_v30  ;;  %v634_v29 = vld [vmem:[#allocation8 + $0x270] sm:$0xff]  ;;  %v637_v30 = vld [vmem:[#allocation8 + $0x288] sm:$0xff] }
 0x250   :  { %v444_v32 = vmax.f32 %v441_v31, 0.0  ;;  %v639_v31 = vld [vmem:[#allocation8 + $0x298] sm:$0xff] }
 0x252   :  { %v448_v33 = vadd.f32 1e-05, %v444_v32  ;;  %v1099_v32 = vpack.c.bf16 %v634_v29, %v632_v19 }
 0x254   :  { %1142 = vrsqrt.f32 %v448_v33  ;;  %v1101_v33 = vpack.c.bf16 %v639_v31, %v637_v30 }
 0x25e   :  { %v1143_v38 = vpop.eup %1142 }
 0x25f   :  { %v469_v40 = vrot.slane %v1143_v38, %v461_v37  ;;  %v1105_v38 = vpack.c.bf16 %v643_v36, %v641_v35 }
 0x261   :  { %v470_v41 = vcombine.low %v462_v39, %v469_v40  ;;  %v640_v39 = vld [vmem:[#allocation8 + $0x2a0] sm:$0xff]  ;;  %v642_v40 = vld [vmem:[#allocation8 + $0x2b0] sm:$0xff] }
 0x263   :  { %v477_v43 = vrot.slane %v470_v41, %v461_v37  ;;  %v645_v41 = vld [vmem:[#allocation8 + $0x2c8] sm:$0xff] }
 0x265   :  { %v479_v44 = vmul.f32 %v477_v43, %v445_v42  ;;  %v647_v42 = vld [vmem:[#allocation8 + $0x2d8] sm:$0xff]  ;;  %v1107_v43 = vpack.c.bf16 %v642_v40, %v640_v39 }
 0x267   :  { %v493_v45 = vrot.slane %v479_v44, %v245_v2  ;;  %v485_v46 = vrot.slane %v479_v44, %v1411_v18  ;;  %v489_v47 = vrot.slane %v479_v44, %v1417_v20  ;;  %v1109_v44 = vpack.c.bf16 %v647_v42, %v645_v41 }
 0x269   :  { %v499_v48 = vmul.f32 %v493_v45, %v411_v28  ;;  %v530_v49 = vmul.f32 %v493_v45, %v388_v5  ;;  %v497_v50 = vmul.f32 %v485_v46, %v409_v51  ;;  %v498_v52 = vmul.f32 %v489_v47, %v410_v53  ;;  %v644_v45 = vld [vmem:[#allocation8 + $0x2c0] sm:$0xff] }
 0x26a   :  { %v529_v17 = vmul.f32 %v489_v47, %v1423_v26  ;;  %v528_v54 = vmul.f32 %v485_v46, %v1421_v24  ;;  %v620_v24 = vld [vmem:[#allocation8 + $0x200] sm:$0xff]  ;;  %v1097_v28 = vpack.c.bf16 %v635_v25, %v633_v23  ;;  %v646_v46 = vld [vmem:[#allocation8 + $0x2d0] sm:$0xff]  ;;  %v649_v47 = vld [vmem:[#allocation8 + $0x2e8] sm:$0xff] }
 0x26b   :  { %v503_v55 = vcombine.low %v497_v50, %v498_v52  ;;  %v517_v56 = vrot.slane %v499_v48, %v461_v37  ;;  %v1087_v10 = vpack.c.bf16 %v622_v3, %v620_v24  ;;  %v651_v48 = vld [vmem:[#allocation8 + $0x2f8] sm:$0xff]  ;;  %v648_v52 = vld [vmem:[#allocation8 + $0x2e0] sm:$0xff] }
 0x26c   :  { %v1113_v50 = vpack.c.bf16 %v651_v48, %v649_v47 }
 0x26d   :  { %v510_v0 = vrot.slane %v503_v55, %v461_v37 }
 0x26f   :  { %v518_v57 = vcombine.low %v510_v0, %v517_v56  ;;  %v652_v56 = vld [vmem:[%s1480_s8] sm:$0x3]  ;;  %s1279_s8 = smov 64  }
 0x271   :  { %v525_v59 = vrot.slane %v518_v57, %v461_v37  ;;  %v661_v57 = vrot.slane %v652_v56, %v1417_v20 }
 0x273   :  { %v527_v60 = vsub.f32 %v480_v58, %v525_v59 }
 0x275   :  { %v539_v61 = vrot.slane %v527_v60, %v1417_v20  ;;  %v535_v62 = vrot.slane %v527_v60, %v1411_v18  ;;  %v543_v51 = vrot.slane %v527_v60, %v245_v2  ;;  %v1091_v2 = vpack.c.bf16 %v626_v13, %v624_v12 }
 0x277   :  { %v548_v53 = vadd.f32 %v539_v61, %v529_v17  ;;  %v547_v63 = vadd.f32 %v535_v62, %v528_v54  ;;  %v1447_v26 = vadd.f32 %v543_v51, %v530_v49  ;;  %v1111_v49 = vpack.c.bf16 %v646_v46, %v644_v45  ;;  %v650_v17 = vld [vmem:[#allocation8 + $0x2f0] sm:$0xff] }
 0x278   :  { %v1115_v54 = vpack.c.bf16 %v650_v17, %v648_v52  ;;  %v657_v51 = vrot.slane %v652_v56, %v1411_v18 }
 0x279   :  { %v551_v4 = vmul.f32 0.2, %v548_v53  ;;  %v550_v5 = vmul.f32 0.2, %v547_v63  ;;  %v552_v55 = vmul.f32 0.2, %v1447_v26 }
 0x27b   :  { %v554_v8 = vmax.f32 %v548_v53, %v551_v4  ;;  %v553_v9 = vmax.f32 %v547_v63, %v550_v5  ;;  %v555_v0 = vmax.f32 %v1447_v26, %v552_v55  ;;  %v806_v53 = vld [vmem:[%s1481_s9] sm:$0xff] }
 0x27d   :  { %728 = vmatprep.mubr.f32.mxu1 %v554_v8 }
 0x27e   :  { %729 = vmatmul.mubr.f32.vlgmr.msra.gmra.mrb[0].mxu1 %v553_v9 }
 0x27f   :  { %1088 = vmatpush1.bf16.msra.mxu1 %v1087_v10  ;;  %799 = vmatprep.mubr.f32.mxu1 %v1276_v1  ;;  %v638_v1 = vld [vmem:[#allocation8 + $0x290] sm:$0xff] }
 0x280   :  { %1090 = vmatprep.subr.bf16.mxu1 %v1089_v11  ;;  %v1103_v37 = vpack.c.bf16 %v638_v1, %v636_v34 }
 0x283   :  { %1092 = vmatpush1.bf16.msra.mxu1 %v1091_v2 }
 0x284   :  { %1094 = vmatprep.subr.bf16.mxu1 %v1093_v16 }
 0x287   :  { %1096 = vmatpush1.bf16.msra.mxu1 %v1095_v27 }
 0x288   :  { %1098 = vmatprep.subr.bf16.mxu1 %v1097_v28 }
 0x28b   :  { %1100 = vmatpush1.bf16.msra.mxu1 %v1099_v32 }
 0x28c   :  { %1102 = vmatprep.subr.bf16.mxu1 %v1101_v33 }
 0x28f   :  { %1104 = vmatpush1.bf16.msra.mxu1 %v1103_v37 }
 0x290   :  { %1106 = vmatprep.subr.bf16.mxu1 %v1105_v38 }
 0x293   :  { %1108 = vmatpush1.bf16.msra.mxu1 %v1107_v43 }
 0x294   :  { %1110 = vmatprep.subr.bf16.mxu1 %v1109_v44 }
 0x297   :  { %1112 = vmatpush1.bf16.msra.mxu1 %v1111_v49 }
 0x298   :  { %1114 = vmatprep.subr.bf16.mxu1 %v1113_v50 }
 0x29b   :  { %1116 = vmatpush1.bf16.msra.mxu1 %v1115_v54 }
 0x29e   :  { %800 = vmatmul.mubr.f32.vlgmr.msra.gmra.mrb[0].mxu1 %v555_v0 }
 0x371   :  { %v801_v58 = vpop.f32.mrb[0].mxu1 }
 0x372   :  { %v803_v59 = vpop.f32.mrb[1].mxu1  ;;  %v1117_v26 = vadd.f32 %v801_v58, %v657_v51 }
 0x373   :  { %v1118_v60 = vadd.f32 %v803_v59, %v661_v57 }
 0x375   :  { %v807_v61 = vmul.f32 0.5, %v1118_v60  ;;  %812 = vrot.lane.b32.xlu0 %v1118_v60, %s1278_s0 }
 0x377   :  { %v808_v62 = vmul.f32 1.442695, %v807_v61 }
 0x379   :  { %1144 = vpow2.f32 %v808_v62 }
 0x383   :  { %v1145_v63 = vpop.eup %1144 }
 0x384   :  { %v810_v24 = vmul.f32 %v1145_v63, %v806_v53 }
 0x386   :  { %v811_v3 = vadd.f32 %v1117_v26, %v810_v24 }
 0x388   :  { %815 = vrot.lane.b32.xlu0 %v811_v3, %s1279_s8 }
 0x3e7   :  { %v813_v20 = vpop.permute.xlu0 %812 }
 0x3e8   :  { %v814_v4 = vadd.f32 %v1117_v26, %v813_v20 }
 0x3fa   :  { %v816_v5 = vpop.permute.xlu0 %815 }
 0x3fb   :  { %v817_v6 = vadd.f32 %v816_v5, %v814_v4 }
 0x3fd   :  { %818 = vst [vmem:[#allocation10] sm:$0xff] %v817_v6 }
 0x3fe   :  { %1245 = shalt.err (!%p1242_p8)
}
 0x3ff   :  { %s1246_s16 = scalar_lea.hbm %s1482_s10, 128 }
 0x400   :  { %p1247_p9 = scmp.ne.s32.totalorder %s1482_s10, %s1246_s16  ;;  %p1250_p10 = scmp.lt.u32.totalorder %s1246_s16, %s1482_s10 }
 0x402   :  { %p1252_p11 = pnand %p1250_p10, %p1247_p9 }
 0x404   :  { %1255 = shalt.err (!%p1252_p11)
}
 0x405   :  { %828 = dma.vmem_to_hbm [thread:$0]  %s826_s12, 128, %s1482_s10, [#allocation4]  }
 0x406   :  { %1262 = dma.done.wait [#allocation4], 128  }
 0x407   :  { %1263 = vsyncadd [#allocation4], 4294967168 }
 0x408   :  { %832 = vsyncpa [#allocation3], 1 }
 0x409   :  { %833 = vsyncpa [#allocation6], 1 }
 0x40a   :  { %834 = vsyncpa [#allocation9], 1 }
 0x40b   :  { %835 = vsyncpa [#allocation4], 1 }

</bundles_post_ra>
